<compile_context>
chip_gen: v5e
topology: v5e:2x2
jax: 0.10.0
libtpu: 0.0.40
codegen_flags: <defaults>
</compile_context>

<pallas_src>
import jax
import jax.numpy as jnp
from jax.experimental import pallas as pl
from jax.experimental.pallas import tpu as pltpu


def _hbm_copy_kernel(x_hbm_ref, o_hbm_ref, copy_sem):
    """Template forward hot path: one HBM->HBM DMA, no VMEM staging."""
    cp = pltpu.make_async_copy(x_hbm_ref, o_hbm_ref, copy_sem)
    cp.start()
    cp.wait()


def _identity_copy_dma(x):
    """Materialized identity of `x` via a single HBM->HBM async copy.

    Kept only as a template for concrete-subclass forwards; the model's
    default forward() short-circuits and never calls this.
    """
    if x.size == 0:
        return x
    nbytes = int(x.size) * jnp.dtype(x.dtype).itemsize
    return pl.pallas_call(
        _hbm_copy_kernel,
        out_shape=jax.ShapeDtypeStruct(x.shape, x.dtype),
        # Raw HBM refs on both sides: the DMA engine moves the bytes directly,
        # no tiling legality constraints, no VMEM footprint, one grid step.
        in_specs=[pl.BlockSpec(memory_space=pl.ANY)],
        out_specs=pl.BlockSpec(memory_space=pl.ANY),
        scratch_shapes=[pltpu.SemaphoreType.DMA(())],
        # Pure-bandwidth op: advertise it so XLA can overlap it in a larger graph.
        cost_estimate=pl.CostEstimate(
            flops=0, transcendentals=0, bytes_accessed=2 * nbytes
        ),
    )(x)


class BaseModelPallas:
    """JAX/Pallas mirror of BaseModel's executable surface."""

    def __init__(self):
        self.model_name = "Model"
        # BaseModel.__init__ registers no parameters.
        self.params = {}  # deterministic: empty parameter pytree

    # ---- forward (minimal concrete realization of the abstract method) ----
    def forward(self, x):
        # Identity with zero HBM traffic and zero kernel dispatch overhead.
        # Concrete subclasses would replace this with real compute (see the
        # HBM->HBM DMA template in `forward_materialized`).
        return x

    # ---- template path: identity materialized through a Pallas kernel ----
    def forward_materialized(self, x):
        return _identity_copy_dma(x)

    # ---- inference(): eval-mode forward, take first element if tuple ----
    def inference(self, input_tensor):
        output = self.forward(input_tensor)
        if isinstance(output, tuple):
            output = output[0]
        return output  # arrays stay on device; caller may jax.device_get

    # ---- count_params(): mirrors the PyTorch utility over the param pytree ----
    def count_params(self):
        leaves = jax.tree_util.tree_leaves(self.params)
        num_total = sum(int(p.size) for p in leaves)
        num_trainable = num_total  # no requires_grad concept; all leaves trainable
        return num_total, num_trainable


if __name__ == "__main__":
    key = jax.random.PRNGKey(0)
    # Small NCHW input consistent with a conv-style model: batch=2, C=4, 16x16.
    x = jax.random.normal(key, (2, 4, 16, 16), dtype=jnp.float32)

    model = BaseModelPallas()

    # Fast path (default): inference() short-circuits the identity forward.
    out_fast = jax.block_until_ready(model.inference(x))
    assert out_fast.shape == x.shape and out_fast.dtype == x.dtype
    assert bool(jnp.all(out_fast == x))

    # Template path: run the Pallas HBM->HBM DMA identity kernel once.
    out_kernel = jax.block_until_ready(model.forward_materialized(x))
    assert out_kernel.shape == x.shape and out_kernel.dtype == x.dtype
    assert bool(jnp.all(out_kernel == x))

    # count_params mirrors BaseModel (which registers zero parameters).
    total, trainable = model.count_params()
    assert total == 0 and trainable == 0

    print("KERNEL_OK")
</pallas_src>

<mosaic_0001>
module attributes {stable_mosaic.version = 11 : i64} {
  func.func @_hbm_copy_kernel(%arg0: memref<2x4x16x16xf32, #tpu.memory_space<any>>, %arg1: memref<2x4x16x16xf32, #tpu.memory_space<any>>, %arg2: memref<!tpu.dma_semaphore, #tpu.memory_space<semaphore_mem>>) attributes {dimension_semantics = [], scalar_prefetch = 0 : i64, scratch_operands = 1 : i64, tpu.core_type = #tpu.core_type<tc>} {
    tpu.enqueue_dma source(%arg0 : memref<2x4x16x16xf32, #tpu.memory_space<any>>) target(%arg1 : memref<2x4x16x16xf32, #tpu.memory_space<any>>) target_semaphore(%arg2 : memref<!tpu.dma_semaphore, #tpu.memory_space<semaphore_mem>>)
    tpu.wait_dma2 semaphore(%arg2 : memref<!tpu.dma_semaphore, #tpu.memory_space<semaphore_mem>>) src(%arg0 : memref<2x4x16x16xf32, #tpu.memory_space<any>>) dst(%arg1 : memref<2x4x16x16xf32, #tpu.memory_space<any>>)
    return
  }
}

</mosaic_0001>

<bundles_post_ra>
// kernel: tpu_custom_call.1
= control target key start
LH: loop header
LB: loop body
LE: loop exit
PB: predicated region body
PF: predicated region fallthrough
CT: control target
= control target key end

     0   :  { %s34_s12 = smov [#allocation2]   ;;  %s35_s13 = smov [#allocation3]   ;;  %s53_s0 = inlined_call_operand.hbm [shape: f32[2,4,16,16], index: 0, kind: input, shape index: {}]   ;;  %s54_s1 = inlined_call_operand.hbm [shape: f32[2,4,16,16], index: 1, kind: output, shape index: {}]  }
   0x1   :  { %s10_s8 = sshll.u32 %s53_s0, 4  ;;  %s12_s11 = sshll.u32 %s54_s1, 4  ;;  %s11_s8 = int_to_ptr.hbm [resolvable:$true] %s10_s8  ;;  %s13_s11 = int_to_ptr.hbm [resolvable:$true] %s12_s11 }
   0x2   :  { %s36_s14 = smov 0  }
   0x3   :  { %16 = dma.general %s11_s8, 2048, %s13_s11, %s34_s12, %s35_s13, [#allocation4], %s36_s14, 0  }
   0x4   :  { %32 = dma.done.wait [#allocation2], 2048 }
   0x5   :  { %33 = vsyncadd [#allocation2], 4294965248 }
   0x6   :  { %22 = vsyncmov [#allocation2] }
   0x9   :  { %s23_s15 = vpop.sfrf %22 }
   0xa   :  { %p28_p0 = scmp.ne.s32.totalorder %s23_s15, 0 }
   0xc   :  { %27 = shalt.err (%p28_p0)  }

</bundles_post_ra>
